<compile_context>
chip_gen: v5e
topology: v5e:2x2
jax: 0.10.0
libtpu: 0.0.40
codegen_flags: <defaults>
</compile_context>

<pallas_src>
import functools

import jax
import jax.numpy as jnp
from jax.experimental import pallas as pl
from jax.experimental.pallas import tpu as pltpu


def _leaky_relu(x, negative_slope=0.01):
    # max(x, a*x) == leaky_relu(x) for 0 < a < 1; 2 VALU ops vs 3 for where().
    return jnp.maximum(x, negative_slope * x)


def _round_up(x, m):
    return (x + m - 1) // m * m


def potential_kernel(x_ref, w1_ref, w2_ref, aux_ref, o_ref):
    # Transposed layout: x is (2D, TILE_P) with time on the 128-lane axis.
    x = x_ref[...]                     # rows 0..D-1 = s_t, rows D..2D-1 = s_{t+1}
    w1 = w1_ref[...]                   # (H, 2D)
    aux = aux_ref[...]                 # (H, 4): columns = [b1, b2, w3, b3]

    # Layer 1 on the VPU: K = 2D (= 8) broadcasted multiply-adds. The MXU would
    # be <1% utilized at M=32, K=8, so keep its pushes for layer 2 only.
    k_dim = x.shape[0]
    acc = aux[:, 0:1]                  # b1, broadcasts (H,1) -> (H, TILE_P)
    for k in range(k_dim):             # static unroll (k_dim = 8)
        acc = acc + w1[:, k:k + 1] * x[k:k + 1, :]
    h1 = _leaky_relu(acc)              # (H, TILE_P)

    # Layer 2 (H x H) on the MXU; constant (H, H) weight is the small operand,
    # activations stream along the TILE_P lanes.
    h2 = jnp.dot(w2_ref[...], h1, preferred_element_type=jnp.float32)
    h2 = _leaky_relu(h2 + aux[:, 1:2])                               # (H, TILE_P)

    # Layer 3 (H -> 1): VPU multiply + sublane reduce; lane-dense (1, TILE_P) store.
    out = jnp.sum(h2 * aux[:, 2:3], axis=0, keepdims=True) + aux[0:1, 3:4]
    o_ref[...] = out.astype(o_ref.dtype)


@functools.partial(jax.jit, static_argnames=("tile_p",))
def potential_forward(states, params, *, tile_p=8192):
    """states: (T, state_dim) float32 -> (T-1, 1) float32."""
    w1, b1, w2, b2, w3, b3 = params
    T, D = states.shape
    P = T - 1
    H = w1.shape[1]
    f32 = jnp.float32

    # ---- adaptive tile width (static: depends only on shapes) --------------
    p128 = max(_round_up(P, 128), 128)
    if p128 <= tile_p:
        if p128 >= 256:
            # Split into two tiles so both v7x TensorCores get work; on
            # single-TC chips two grid steps cost ~0.7 us, negligible.
            tile = _round_up(pl.cdiv(p128, 2), 128)
        else:
            # Tiny trajectory: one 128-wide tile, no extra padding waste.
            tile = p128
    else:
        tile = tile_p
    num_tiles = pl.cdiv(P, tile)
    L = num_tiles * tile

    # ---- operands -----------------------------------------------------------
    # One stacked lane-dense stream: pairs^T, shape (2D, L).
    x = jnp.concatenate([states[:-1], states[1:]], axis=-1).T.astype(f32)
    x = jnp.pad(x, ((0, 0), (0, L - P)))

    w1_t = w1.T.astype(f32)            # (H, 2D)  -- single stacked layer-1 weight
    w2_t = w2.T.astype(f32)            # (H, H)
    aux = jnp.concatenate(
        [b1.reshape(H, 1),
         b2.reshape(H, 1),
         w3.reshape(H, 1),
         jnp.broadcast_to(b3.reshape(1, 1), (H, 1))],
        axis=1,
    ).astype(f32)                      # (H, 4): [b1, b2, w3, b3]

    def const(shape):
        # Tiny constant operand: stays VMEM-resident across all grid steps.
        return pl.BlockSpec(shape, lambda i: (0, 0))

    out = pl.pallas_call(
        potential_kernel,
        out_shape=jax.ShapeDtypeStruct((1, L), f32),
        grid_spec=pltpu.PrefetchScalarGridSpec(
            num_scalar_prefetch=0,
            grid=(num_tiles,),
            in_specs=[
                pl.BlockSpec((2 * D, tile), lambda i: (0, i)),   # pipelined input tile
                const((H, 2 * D)),
                const((H, H)),
                const((H, 4)),
            ],
            out_specs=pl.BlockSpec((1, tile), lambda i: (0, i)),  # lane-dense store
        ),
        compiler_params=pltpu.CompilerParams(
            dimension_semantics=("parallel",),   # independent tiles -> megacore-shardable
            vmem_limit_bytes=32 * 1024 * 1024,   # safe on v7x's 64 MiB VMEM too
        ),
    )(x, w1_t, w2_t, aux)

    return out[0, :P].reshape(P, 1)


def init_params(key, state_dim, hidden_dim):
    """Deterministic synthetic params; shapes match nn.Linear layers (transposed, (in,out))."""
    k1, k2, k3, k4, k5, k6 = jax.random.split(key, 6)
    d_in = 2 * state_dim
    w1 = jax.random.normal(k1, (d_in, hidden_dim), jnp.float32) * (1.0 / jnp.sqrt(d_in))
    b1 = jax.random.normal(k2, (1, hidden_dim), jnp.float32) * 0.01
    w2 = jax.random.normal(k3, (hidden_dim, hidden_dim), jnp.float32) * (1.0 / jnp.sqrt(hidden_dim))
    b2 = jax.random.normal(k4, (1, hidden_dim), jnp.float32) * 0.01
    w3 = jax.random.normal(k5, (hidden_dim, 1), jnp.float32) * (1.0 / jnp.sqrt(hidden_dim))
    b3 = jax.random.normal(k6, (1, 1), jnp.float32) * 0.01
    return (w1, b1, w2, b2, w3, b3)


def reference_forward(states, params):
    w1, b1, w2, b2, w3, b3 = params
    x = jnp.concatenate([states[:-1], states[1:]], axis=-1)
    h1 = _leaky_relu(x @ w1 + b1)
    h2 = _leaky_relu(h1 @ w2 + b2)
    return h2 @ w3 + b3


# TODO(synk): Potential.calculate_loss (host-side training loop with random
# dropout masks over trajectories) is not part of forward and is not kernelized.

if __name__ == "__main__":
    state_dim = 4
    hidden_dim = 32

    key = jax.random.PRNGKey(0)
    k_states, k_params, k_states2, k_states3 = jax.random.split(key, 4)
    params = init_params(k_params, state_dim, hidden_dim)

    # Case 1: tiny trajectory (P = 8) -> single 128-wide tile (no over-padding).
    T1 = 9
    states1 = jax.random.normal(k_states, (T1, state_dim), jnp.float32)
    out1 = jax.block_until_ready(potential_forward(states1, params))
    ref1 = reference_forward(states1, params)
    assert out1.shape == (T1 - 1, 1), out1.shape
    assert jnp.allclose(out1, ref1, atol=1e-4, rtol=1e-4), (out1, ref1)

    # Case 2: medium trajectory (P = 999) -> two 512-wide tiles (both v7x TCs busy).
    T2 = 1000
    states2 = jax.random.normal(k_states2, (T2, state_dim), jnp.float32)
    out2 = jax.block_until_ready(potential_forward(states2, params))
    ref2 = reference_forward(states2, params)
    assert out2.shape == (T2 - 1, 1), out2.shape
    assert jnp.allclose(out2, ref2, atol=1e-4, rtol=1e-4)

    # Case 3: longer trajectory with explicit tile_p -> 3-tile pipelined grid.
    T3 = 5000
    states3 = jax.random.normal(k_states3, (T3, state_dim), jnp.float32)
    out3 = jax.block_until_ready(potential_forward(states3, params, tile_p=2048))
    ref3 = reference_forward(states3, params)
    assert out3.shape == (T3 - 1, 1), out3.shape
    assert jnp.allclose(out3, ref3, atol=1e-4, rtol=1e-4)

    print("KERNEL_OK")
</pallas_src>

<mosaic_0001>
module attributes {stable_mosaic.version = 11 : i64} {
  func.func @potential_kernel(%arg0: i32, %arg1: memref<8x128xf32, #tpu.memory_space<vmem>>, %arg2: memref<32x8xf32, #tpu.memory_space<vmem>>, %arg3: memref<32x32xf32, #tpu.memory_space<vmem>>, %arg4: memref<32x4xf32, #tpu.memory_space<vmem>>, %arg5: memref<1x128xf32, #tpu.memory_space<vmem>>) attributes {dimension_semantics = [#tpu.dimension_semantics<parallel>], iteration_bounds = array<i64: 1>, scalar_prefetch = 0 : i64, scratch_operands = 0 : i64, tpu.core_type = #tpu.core_type<tc>, window_params = [{transform_indices = @transform_0, window_bounds = array<i64: 8, 128>}, {pipeline_mode = #tpu.pipeline_mode<synchronous>, transform_indices = @transform_1, window_bounds = array<i64: 32, 8>}, {pipeline_mode = #tpu.pipeline_mode<synchronous>, transform_indices = @transform_2, window_bounds = array<i64: 32, 32>}, {pipeline_mode = #tpu.pipeline_mode<synchronous>, transform_indices = @transform_3, window_bounds = array<i64: 32, 4>}, {transform_indices = @transform_4, window_bounds = array<i64: 1, 128>}]} {
    %c0 = arith.constant 0 : index
    %c0_0 = arith.constant 0 : index
    %0 = vector.load %arg1[%c0, %c0_0] : memref<8x128xf32, #tpu.memory_space<vmem>>, vector<8x128xf32>
    %c0_1 = arith.constant 0 : index
    %c0_2 = arith.constant 0 : index
    %1 = vector.load %arg2[%c0_1, %c0_2] : memref<32x8xf32, #tpu.memory_space<vmem>>, vector<32x8xf32>
    %c0_3 = arith.constant 0 : index
    %c0_4 = arith.constant 0 : index
    %2 = vector.load %arg4[%c0_3, %c0_4] : memref<32x4xf32, #tpu.memory_space<vmem>>, vector<32x4xf32>
    %3 = vector.extract_strided_slice %2 {offsets = [0, 0], sizes = [32, 1], strides = [1, 1]} : vector<32x4xf32> to vector<32x1xf32>
    %4 = vector.extract_strided_slice %1 {offsets = [0, 0], sizes = [32, 1], strides = [1, 1]} : vector<32x8xf32> to vector<32x1xf32>
    %5 = vector.extract_strided_slice %0 {offsets = [0, 0], sizes = [1, 128], strides = [1, 1]} : vector<8x128xf32> to vector<1x128xf32>
    %6 = vector.broadcast %4 : vector<32x1xf32> to vector<32x128xf32>
    %7 = vector.broadcast %5 : vector<1x128xf32> to vector<32x128xf32>
    %8 = arith.mulf %6, %7 : vector<32x128xf32>
    %9 = vector.broadcast %3 : vector<32x1xf32> to vector<32x128xf32>
    %10 = arith.addf %9, %8 : vector<32x128xf32>
    %11 = vector.extract_strided_slice %1 {offsets = [0, 1], sizes = [32, 1], strides = [1, 1]} : vector<32x8xf32> to vector<32x1xf32>
    %12 = vector.extract_strided_slice %0 {offsets = [1, 0], sizes = [1, 128], strides = [1, 1]} : vector<8x128xf32> to vector<1x128xf32>
    %13 = vector.broadcast %11 : vector<32x1xf32> to vector<32x128xf32>
    %14 = vector.broadcast %12 : vector<1x128xf32> to vector<32x128xf32>
    %15 = arith.mulf %13, %14 : vector<32x128xf32>
    %16 = arith.addf %10, %15 : vector<32x128xf32>
    %17 = vector.extract_strided_slice %1 {offsets = [0, 2], sizes = [32, 1], strides = [1, 1]} : vector<32x8xf32> to vector<32x1xf32>
    %18 = vector.extract_strided_slice %0 {offsets = [2, 0], sizes = [1, 128], strides = [1, 1]} : vector<8x128xf32> to vector<1x128xf32>
    %19 = vector.broadcast %17 : vector<32x1xf32> to vector<32x128xf32>
    %20 = vector.broadcast %18 : vector<1x128xf32> to vector<32x128xf32>
    %21 = arith.mulf %19, %20 : vector<32x128xf32>
    %22 = arith.addf %16, %21 : vector<32x128xf32>
    %23 = vector.extract_strided_slice %1 {offsets = [0, 3], sizes = [32, 1], strides = [1, 1]} : vector<32x8xf32> to vector<32x1xf32>
    %24 = vector.extract_strided_slice %0 {offsets = [3, 0], sizes = [1, 128], strides = [1, 1]} : vector<8x128xf32> to vector<1x128xf32>
    %25 = vector.broadcast %23 : vector<32x1xf32> to vector<32x128xf32>
    %26 = vector.broadcast %24 : vector<1x128xf32> to vector<32x128xf32>
    %27 = arith.mulf %25, %26 : vector<32x128xf32>
    %28 = arith.addf %22, %27 : vector<32x128xf32>
    %29 = vector.extract_strided_slice %1 {offsets = [0, 4], sizes = [32, 1], strides = [1, 1]} : vector<32x8xf32> to vector<32x1xf32>
    %30 = vector.extract_strided_slice %0 {offsets = [4, 0], sizes = [1, 128], strides = [1, 1]} : vector<8x128xf32> to vector<1x128xf32>
    %31 = vector.broadcast %29 : vector<32x1xf32> to vector<32x128xf32>
    %32 = vector.broadcast %30 : vector<1x128xf32> to vector<32x128xf32>
    %33 = arith.mulf %31, %32 : vector<32x128xf32>
    %34 = arith.addf %28, %33 : vector<32x128xf32>
    %35 = vector.extract_strided_slice %1 {offsets = [0, 5], sizes = [32, 1], strides = [1, 1]} : vector<32x8xf32> to vector<32x1xf32>
    %36 = vector.extract_strided_slice %0 {offsets = [5, 0], sizes = [1, 128], strides = [1, 1]} : vector<8x128xf32> to vector<1x128xf32>
    %37 = vector.broadcast %35 : vector<32x1xf32> to vector<32x128xf32>
    %38 = vector.broadcast %36 : vector<1x128xf32> to vector<32x128xf32>
    %39 = arith.mulf %37, %38 : vector<32x128xf32>
    %40 = arith.addf %34, %39 : vector<32x128xf32>
    %41 = vector.extract_strided_slice %1 {offsets = [0, 6], sizes = [32, 1], strides = [1, 1]} : vector<32x8xf32> to vector<32x1xf32>
    %42 = vector.extract_strided_slice %0 {offsets = [6, 0], sizes = [1, 128], strides = [1, 1]} : vector<8x128xf32> to vector<1x128xf32>
    %43 = vector.broadcast %41 : vector<32x1xf32> to vector<32x128xf32>
    %44 = vector.broadcast %42 : vector<1x128xf32> to vector<32x128xf32>
    %45 = arith.mulf %43, %44 : vector<32x128xf32>
    %46 = arith.addf %40, %45 : vector<32x128xf32>
    %47 = vector.extract_strided_slice %1 {offsets = [0, 7], sizes = [32, 1], strides = [1, 1]} : vector<32x8xf32> to vector<32x1xf32>
    %48 = vector.extract_strided_slice %0 {offsets = [7, 0], sizes = [1, 128], strides = [1, 1]} : vector<8x128xf32> to vector<1x128xf32>
    %49 = vector.broadcast %47 : vector<32x1xf32> to vector<32x128xf32>
    %50 = vector.broadcast %48 : vector<1x128xf32> to vector<32x128xf32>
    %51 = arith.mulf %49, %50 : vector<32x128xf32>
    %52 = arith.addf %46, %51 : vector<32x128xf32>
    %cst = arith.constant 0.00999999977 : f32
    %53 = vector.broadcast %cst : f32 to vector<32x128xf32>
    %54 = arith.mulf %53, %52 : vector<32x128xf32>
    %55 = arith.maximumf %52, %54 : vector<32x128xf32>
    %c0_5 = arith.constant 0 : index
    %c0_6 = arith.constant 0 : index
    %56 = vector.load %arg3[%c0_5, %c0_6] : memref<32x32xf32, #tpu.memory_space<vmem>>, vector<32x32xf32>
    %cst_7 = arith.constant dense<0.000000e+00> : vector<32x128xf32>
    %57 = tpu.matmul %56, %55, %cst_7 {dimension_numbers = #tpu.dot_dimension_numbers<[1], [0], [0], [1], [0, 0, 1, 1], [], []>} : vector<32x32xf32>, vector<32x128xf32>, vector<32x128xf32> -> vector<32x128xf32>
    %58 = vector.extract_strided_slice %2 {offsets = [0, 1], sizes = [32, 1], strides = [1, 1]} : vector<32x4xf32> to vector<32x1xf32>
    %59 = vector.broadcast %58 : vector<32x1xf32> to vector<32x128xf32>
    %60 = arith.addf %57, %59 : vector<32x128xf32>
    %cst_8 = arith.constant 0.00999999977 : f32
    %61 = vector.broadcast %cst_8 : f32 to vector<32x128xf32>
    %62 = arith.mulf %61, %60 : vector<32x128xf32>
    %63 = arith.maximumf %60, %62 : vector<32x128xf32>
    %64 = vector.extract_strided_slice %2 {offsets = [0, 2], sizes = [32, 1], strides = [1, 1]} : vector<32x4xf32> to vector<32x1xf32>
    %65 = vector.broadcast %64 : vector<32x1xf32> to vector<32x128xf32>
    %66 = arith.mulf %63, %65 : vector<32x128xf32>
    %cst_9 = arith.constant dense<0.000000e+00> : vector<128xf32>
    %67 = vector.multi_reduction <add>, %66, %cst_9 [0] : vector<32x128xf32> to vector<128xf32>
    %68 = vector.shape_cast %67 : vector<128xf32> to vector<1x128xf32>
    %69 = vector.extract_strided_slice %2 {offsets = [0, 3], sizes = [1, 1], strides = [1, 1]} : vector<32x4xf32> to vector<1x1xf32>
    %70 = vector.broadcast %69 : vector<1x1xf32> to vector<1x128xf32>
    %71 = arith.addf %68, %70 : vector<1x128xf32>
    %c0_10 = arith.constant 0 : index
    %c0_11 = arith.constant 0 : index
    %72 = vector.load %arg5[%c0_10, %c0_11] : memref<1x128xf32, #tpu.memory_space<vmem>>, vector<1x128xf32>
    tpu.vector_store %arg5[%c0_10, %c0_11], %71 {strides = array<i32>} : memref<1x128xf32, #tpu.memory_space<vmem>>, vector<1x128xf32>,
    return
  }
  func.func @transform_0(%arg0: i32) -> (i32, i32) {
    %c0_i32 = arith.constant 0 : i32
    %c0_i32_0 = arith.constant 0 : i32
    return %c0_i32, %arg0 : i32, i32
  }
  func.func @transform_1(%arg0: i32) -> (i32, i32) {
    %c0_i32 = arith.constant 0 : i32
    %c0_i32_0 = arith.constant 0 : i32
    %c0_i32_1 = arith.constant 0 : i32
    return %c0_i32, %c0_i32_0 : i32, i32
  }
  func.func @transform_2(%arg0: i32) -> (i32, i32) {
    %c0_i32 = arith.constant 0 : i32
    %c0_i32_0 = arith.constant 0 : i32
    %c0_i32_1 = arith.constant 0 : i32
    return %c0_i32, %c0_i32_0 : i32, i32
  }
  func.func @transform_3(%arg0: i32) -> (i32, i32) {
    %c0_i32 = arith.constant 0 : i32
    %c0_i32_0 = arith.constant 0 : i32
    %c0_i32_1 = arith.constant 0 : i32
    return %c0_i32, %c0_i32_0 : i32, i32
  }
  func.func @transform_4(%arg0: i32) -> (i32, i32) {
    %c0_i32 = arith.constant 0 : i32
    %c0_i32_0 = arith.constant 0 : i32
    return %c0_i32, %arg0 : i32, i32
  }
}

</mosaic_0001>

<bundles_post_ra>
// kernel: potential_forward.1
= control target key start
LH: loop header
LB: loop body
LE: loop exit
PB: predicated region body
PF: predicated region fallthrough
CT: control target
= control target key end

     0   :  { %v420_v0 = vmov 0   ;;  %v421_v9 = vmov 1   ;;  %v422_v10 = vmov 2   ;;  %v423_v11 = vmov 3   ;;  %s610_s3 = inlined_call_operand.vmem [shape: f32[32,4], index: 3, kind: input, shape index: {}]   ;;  %s611_s1 = inlined_call_operand.vmem [shape: f32[32,8], index: 1, kind: input, shape index: {}]   ;;  %s612_s0 = inlined_call_operand.vmem [shape: f32[8,128], index: 0, kind: input, shape index: {}]   ;;  %s613_s2 = inlined_call_operand.vmem [shape: f32[32,32], index: 2, kind: input, shape index: {}]   ;;  %s614_s4 = inlined_call_operand.vmem [shape: f32[1,128], index: 4, kind: output, shape index: {}]  }
   0x1   :  { %393 = vset.pattern.permute.xlu2 %v420_v0  ;;  %392 = vset.pattern.permute.xlu1 %v420_v0  ;;  %v456_v1 = vld [vmem:[%s610_s3] sm:$0xff]  ;;  %v20_v2 = vld [vmem:[%s611_s1 + $0x10] sm:$0xff]  ;;  %v471_v4 = vld [vmem:[%s610_s3 + $0x8] sm:$0xff]  ;;  %v424_v12 = vmov 4   ;;  %v425_v13 = vmov 5   ;;  %v426_v14 = vmov 7  }
   0x2   :  { %v464_v3 = vld [vmem:[%s611_s1] sm:$0xff]  ;;  %391 = vset.pattern.permute.xlu0 %v420_v0  ;;  %53 = vperm.xlu2 %393, %v456_v1   ;;  %v21_v5 = vld [vmem:[%s611_s1 + $0x18] sm:$0xff]  ;;  %v479_v6 = vld [vmem:[%s611_s1 + $0x8] sm:$0xff]  ;;  %v427_v15 = vmov 6   ;;  %vm278_vm0 = vcmask 261120  }
   0x3   :  { %38 = vperm.xlu1 %392, %v20_v2   ;;  %28 = vperm.xlu0 %391, %v464_v3   ;;  %v486_v7 = vld [vmem:[%s610_s3 + $0x18] sm:$0xff]  ;;  %v491_v8 = vld [vmem:[%s610_s3 + $0x10] sm:$0xff]  ;;  %v522_v19 = vld [vmem:[%s612_s0] sm:$0xff] }
   0x4   :  { %v46_v20 = vperm.slane %v522_v19, 0  ;;  %v546_v43 = vperm.slane %v522_v19, 1  ;;  %v549_v45 = vperm.slane %v522_v19, 2  ;;  %v553_v50 = vperm.slane %v522_v19, 3 }
   0x5   :  { %v557_v54 = vperm.slane %v522_v19, 4  ;;  %v566_v0 = vperm.slane %v522_v19, 5 }
   0xa   :  { %58 = vperm.xlu2 %393, %v471_v4  }
   0xb   :  { %43 = vperm.xlu1 %392, %v21_v5   ;;  %33 = vperm.xlu0 %391, %v479_v6  }
  0x12   :  { %394 = vset.pattern.permute.xlu2 %v421_v9 }
  0x13   :  { %68 = vperm.xlu1 %392, %v486_v7   ;;  %63 = vperm.xlu0 %391, %v491_v8  }
  0x14   :  { %88 = vperm.xlu2 %394, %v21_v5  }
  0x1b   :  { %396 = vset.pattern.permute.xlu1 %v422_v10  ;;  %395 = vset.pattern.permute.xlu0 %v421_v9 }
  0x1c   :  { %113 = vperm.xlu1 %396, %v21_v5   ;;  %80 = vperm.xlu2 %394, %v479_v6  }
  0x1d   :  { %84 = vperm.xlu0 %395, %v20_v2  }
  0x24   :  { %109 = vperm.xlu1 %396, %v20_v2   ;;  %397 = vset.pattern.permute.xlu2 %v423_v11 }
  0x25   :  { %76 = vperm.xlu0 %395, %v464_v3   ;;  %138 = vperm.xlu2 %397, %v21_v5  }
  0x2c   :  { %105 = vperm.xlu1 %396, %v479_v6  }
  0x2d   :  { %398 = vset.pattern.permute.xlu0 %v424_v12  ;;  %134 = vperm.xlu2 %397, %v20_v2  }
  0x2e   :  { %163 = vperm.xlu0 %398, %v21_v5  }
  0x34   :  { %101 = vperm.xlu1 %396, %v464_v3  }
  0x35   :  { %130 = vperm.xlu2 %397, %v479_v6  }
  0x36   :  { %401 = vset.pattern.permute.xlu0 %v423_v11 }
  0x37   :  { %126 = vperm.xlu0 %401, %v464_v3  }
  0x3c   :  { %399 = vset.pattern.permute.xlu1 %v424_v12 }
  0x3d   :  { %400 = vset.pattern.permute.xlu2 %v425_v13  ;;  %159 = vperm.xlu1 %399, %v20_v2  }
  0x3e   :  { %188 = vperm.xlu2 %400, %v21_v5  }
  0x3f   :  { %404 = vset.pattern.permute.xlu0 %v425_v13 }
  0x40   :  { %180 = vperm.xlu0 %404, %v479_v6  }
  0x45   :  { %155 = vperm.xlu1 %399, %v479_v6  }
  0x46   :  { %184 = vperm.xlu2 %400, %v20_v2  }
  0x48   :  { %408 = vset.pattern.permute.xlu0 %v426_v14 }
  0x49   :  { %234 = vperm.xlu0 %408, %v20_v2  }
  0x4d   :  { %402 = vset.pattern.permute.xlu1 %v427_v15 }
  0x4e   :  { %403 = vset.pattern.permute.xlu2 %v424_v12  ;;  %213 = vperm.xlu1 %402, %v21_v5   ;;  %v573_v12 = vperm.slane %v522_v19, 7 }
  0x4f   :  { %151 = vperm.xlu2 %403, %v464_v3  }
  0x51   :  { %413 = vset.pattern.permute.xlu0 %v421_v9 }
  0x52   :  { %267 = vperm.xlu0 %413, %v471_v4  }
  0x56   :  { %209 = vperm.xlu1 %402, %v20_v2  }
  0x57   :  { %405 = vset.pattern.permute.xlu2 %v426_v14 }
  0x58   :  { %238 = vperm.xlu2 %405, %v21_v5  }
  0x5a   :  { %417 = vset.pattern.permute.xlu0 %v422_v10 }
  0x5b   :  { %337 = vperm.xlu0 %417, %v491_v8  }
  0x5c   :  { %v54_v16 = vpop.permute.xlu2 %53 }
  0x5e   :  { %406 = vset.pattern.permute.xlu1 %v425_v13 }
  0x5f   :  { %176 = vperm.xlu1 %406, %v464_v3  }
  0x60   :  { %407 = vset.pattern.permute.xlu2 %v427_v15 }
  0x61   :  { %205 = vperm.xlu2 %407, %v479_v6  }
  0x63   :  { %419 = vset.pattern.permute.xlu0 %v423_v11 }
  0x64   :  { %v59_v17 = vpop.permute.xlu2 %58 }
  0x67   :  { %409 = vset.pattern.permute.xlu1 %v427_v15 }
  0x68   :  { %201 = vperm.xlu1 %409, %v464_v3  }
  0x69   :  { %410 = vset.pattern.permute.xlu2 %v426_v14 }
  0x6a   :  { %230 = vperm.xlu2 %410, %v479_v6  }
  0x6e   :  { %v89_v18 = vpop.permute.xlu2 %88 }
  0x6f   :  { %v95_v47 = vmul.f32 %v546_v43, %v89_v18  ;;  %v216_v18 = vperm.slane %v522_v19, 6 }
  0x70   :  { %411 = vset.pattern.permute.xlu1 %v426_v14 }
  0x71   :  { %226 = vperm.xlu1 %411, %v464_v3  }
  0x72   :  { %412 = vset.pattern.permute.xlu2 %v421_v9 }
  0x73   :  { %263 = vperm.xlu2 %412, %v456_v1  }
  0x75   :  { %v39_v21 = vpop.permute.xlu1 %38  ;;  %v29_v22 = vpop.permute.xlu0 %28 }
  0x76   :  { %v47_v23 = vmul.f32 %v46_v20, %v29_v22  ;;  %v81_v24 = vpop.permute.xlu2 %80  ;;  %v49_v62 = vmul.f32 %v46_v20, %v39_v21 }
  0x77   :  { %v93_v55 = vmul.f32 %v546_v43, %v81_v24 }
  0x78   :  { %v527_v25 = vadd.f32 %v54_v16, %v47_v23 }
  0x79   :  { %414 = vset.pattern.permute.xlu1 %v421_v9 }
  0x7a   :  { %271 = vperm.xlu1 %414, %v491_v8  }
  0x7b   :  { %275 = vperm.xlu2 %412, %v486_v7  }
  0x7d   :  { %v44_v26 = vpop.permute.xlu1 %43  ;;  %v34_v28 = vpop.permute.xlu0 %33 }
  0x7e   :  { %v50_v44 = vmul.f32 %v46_v20, %v44_v26  ;;  %v48_v49 = vmul.f32 %v46_v20, %v34_v28 }
  0x7f   :  { %v139_v27 = vpop.permute.xlu2 %138 }
  0x80   :  { %v72_v56 = vadd.f32 %v59_v17, %v48_v49  ;;  %v145_v57 = vmul.f32 %v553_v50, %v139_v27 }
  0x82   :  { %415 = vset.pattern.permute.xlu1 %v422_v10  ;;  %v97_v2 = vadd.f32 %v93_v55, %v72_v56 }
  0x83   :  { %329 = vperm.xlu1 %415, %v456_v1   ;;  %416 = vset.pattern.permute.xlu2 %v422_v10 }
  0x84   :  { %333 = vperm.xlu2 %416, %v471_v4  }
  0x85   :  { %v69_v29 = vpop.permute.xlu1 %68  ;;  %v64_v31 = vpop.permute.xlu0 %63 }
  0x86   :  { %v74_v48 = vadd.f32 %v69_v29, %v50_v44  ;;  %v73_v3 = vadd.f32 %v64_v31, %v49_v62 }
  0x87   :  { %v135_v30 = vpop.permute.xlu2 %134 }
  0x88   :  { %v99_v53 = vadd.f32 %v95_v47, %v74_v48  ;;  %v144_v14 = vmul.f32 %v553_v50, %v135_v30 }
  0x8b   :  { %341 = vperm.xlu1 %415, %v486_v7  }
  0x8c   :  { %418 = vset.pattern.permute.xlu2 %v423_v11 }
  0x8d   :  { %358 = vperm.xlu2 %418, %v456_v1  }
  0x8e   :  { %v114_v32 = vpop.permute.xlu1 %113 }
  0x8f   :  { %v131_v33 = vpop.permute.xlu2 %130  ;;  %v85_v35 = vpop.permute.xlu0 %84  ;;  %v120_v51 = vmul.f32 %v549_v45, %v114_v32 }
  0x90   :  { %v94_v63 = vmul.f32 %v546_v43, %v85_v35  ;;  %v143_v11 = vmul.f32 %v553_v50, %v131_v33 }
  0x91   :  { %v124_v58 = vadd.f32 %v120_v51, %v99_v53 }
  0x92   :  { %v98_v8 = vadd.f32 %v94_v63, %v73_v3 }
  0x93   :  { %v149_v5 = vadd.f32 %v145_v57, %v124_v58 }
  0x96   :  { %v110_v34 = vpop.permute.xlu1 %109 }
  0x97   :  { %v539_v39 = vpop.permute.xlu0 %76  ;;  %v119_v4 = vmul.f32 %v549_v45, %v110_v34 }
  0x98   :  { %v189_v36 = vpop.permute.xlu2 %188  ;;  %v92_v58 = vmul.f32 %v546_v43, %v539_v39 }
  0x99   :  { %v195_v9 = vmul.f32 %v566_v0, %v189_v36  ;;  %v123_v15 = vadd.f32 %v119_v4, %v98_v8 }
  0x9a   :  { %v96_v62 = vadd.f32 %v92_v58, %v527_v25 }
  0x9b   :  { %v148_v28 = vadd.f32 %v144_v14, %v123_v15 }
  0x9e   :  { %v106_v37 = vpop.permute.xlu1 %105 }
  0x9f   :  { %v118_v60 = vmul.f32 %v549_v45, %v106_v37 }
  0xa0   :  { %v185_v38 = vpop.permute.xlu2 %184  ;;  %v164_v42 = vpop.permute.xlu0 %163 }
  0xa1   :  { %v170_v1 = vmul.f32 %v557_v54, %v164_v42  ;;  %v122_v6 = vadd.f32 %v118_v60, %v97_v2  ;;  %v194_v31 = vmul.f32 %v566_v0, %v185_v38 }
  0xa3   :  { %v174_v10 = vadd.f32 %v170_v1, %v149_v5  ;;  %v147_v17 = vadd.f32 %v143_v11, %v122_v6 }
  0xa5   :  { %v199_v22 = vadd.f32 %v195_v9, %v174_v10 }
  0xa6   :  { %v541_v40 = vpop.permute.xlu1 %101 }
  0xa9   :  { %v543_v41 = vpop.permute.xlu2 %151  ;;  %v561_v59 = vpop.permute.xlu0 %126 }
  0xaa   :  { %v142_v1 = vmul.f32 %v553_v50, %v561_v59  ;;  %v167_v43 = vmul.f32 %v557_v54, %v543_v41  ;;  %v258_v50 = vld [vmem:[%s613_s2] sm:$0xff]  ;;  %v259_v41 = vld [vmem:[%s613_s2 + $0x8] sm:$0xff]  ;;  %v261_v59 = vld [vmem:[%s613_s2 + $0x18] sm:$0xff] }
  0xaf   :  { %v160_v46 = vpop.permute.xlu1 %159 }
  0xb0   :  { %v169_v20 = vmul.f32 %v557_v54, %v160_v46 }
  0xb2   :  { %v239_v52 = vpop.permute.xlu2 %238  ;;  %v181_v16 = vpop.permute.xlu0 %180  ;;  %v173_v30 = vadd.f32 %v169_v20, %v148_v28 }
  0xb3   :  { %v245_v23 = vmul.f32 %v573_v12, %v239_v52  ;;  %v193_v26 = vmul.f32 %v566_v0, %v181_v16 }
  0xb4   :  { %v198_v44 = vadd.f32 %v194_v31, %v173_v30 }
  0xb7   :  { %v156_v61 = vpop.permute.xlu1 %155 }
  0xb8   :  { %v168_v13 = vmul.f32 %v557_v54, %v156_v61  ;;  %v117_v61 = vmul.f32 %v549_v45, %v541_v40  ;;  %v260_v54 = vld [vmem:[%s613_s2 + $0x10] sm:$0xff] }
  0xba   :  { %v172_v24 = vadd.f32 %v168_v13, %v147_v17  ;;  %v121_v63 = vadd.f32 %v117_v61, %v96_v62 }
  0xbb   :  { %v206_v7 = vpop.permute.xlu2 %205  ;;  %v235_v19 = vpop.permute.xlu0 %234 }
  0xbc   :  { %v197_v33 = vadd.f32 %v193_v26, %v172_v24  ;;  %v218_v34 = vmul.f32 %v216_v18, %v206_v7  ;;  %v244_v49 = vmul.f32 %v573_v12, %v235_v19  ;;  %v146_v39 = vadd.f32 %v142_v1, %v121_v63 }
  0xbe   :  { %v222_v46 = vadd.f32 %v218_v34, %v197_v33  ;;  %v171_v40 = vadd.f32 %v167_v43, %v146_v39 }
  0xc0   :  { %v214_v21 = vpop.permute.xlu1 %213 }
  0xc1   :  { %v220_v27 = vmul.f32 %v216_v18, %v214_v21 }
  0xc3   :  { %v224_v29 = vadd.f32 %v220_v27, %v199_v22 }
  0xc4   :  { %v231_v32 = vpop.permute.xlu2 %230 }
  0xc5   :  { %v249_v35 = vadd.f32 %v245_v23, %v224_v29  ;;  %v243_v37 = vmul.f32 %v573_v12, %v231_v32 }
  0xc7   :  { %v253_v36 = vmul.f32 0.01, %v249_v35  ;;  %v247_v51 = vadd.f32 %v243_v37, %v222_v46 }
  0xc8   :  { %v210_v42 = vpop.permute.xlu1 %209 }
  0xc9   :  { %v257_v47 = vmax.f32 %v249_v35, %v253_v36  ;;  %v219_v48 = vmul.f32 %v216_v18, %v210_v42  ;;  %v251_v53 = vmul.f32 0.01, %v247_v51 }
  0xcb   :  { %v223_v52 = vadd.f32 %v219_v48, %v198_v44  ;;  %303 = vmatpush.msra.mxu0 %v257_v47  ;;  %371 = vmatpush.msra.mxu1 %v257_v47  ;;  %v255_v60 = vmax.f32 %v247_v51, %v251_v53 }
  0xcc   :  { %372 = vmatpush.msra.mxu2 %v257_v47  ;;  %373 = vmatpush.msra.mxu3 %v257_v47 }
  0xcd   :  { %v248_v38 = vadd.f32 %v244_v49, %v223_v52 }
  0xcf   :  { %v252_v55 = vmul.f32 0.01, %v248_v38 }
  0xd1   :  { %v256_v56 = vmax.f32 %v248_v38, %v252_v55  ;;  %v177_v57 = vpop.permute.xlu1 %176 }
  0xd2   :  { %v192_v3 = vmul.f32 %v566_v0, %v177_v57  ;;  %v264_v0 = vpop.permute.xlu2 %263 }
  0xd3   :  { %304 = vmatpush.msra.mxu0 %v256_v56  ;;  %374 = vmatpush.msra.mxu1 %v256_v56 }
  0xd4   :  { %375 = vmatpush.msra.mxu2 %v256_v56  ;;  %376 = vmatpush.msra.mxu3 %v256_v56  ;;  %v196_v4 = vadd.f32 %v192_v3, %v171_v40 }
  0xd5   :  { %305 = vmatpush.msra.mxu0 %v255_v60  ;;  %377 = vmatpush.msra.mxu1 %v255_v60 }
  0xd6   :  { %378 = vmatpush.msra.mxu2 %v255_v60  ;;  %379 = vmatpush.msra.mxu3 %v255_v60 }
  0xda   :  { %v202_v2 = vpop.permute.xlu1 %201  ;;  %v276_v11 = vpop.permute.xlu2 %275 }
  0xdb   :  { %v217_v45 = vmul.f32 %v216_v18, %v202_v2 }
  0xdd   :  { %v221_v6 = vadd.f32 %v217_v45, %v196_v4 }
  0xe2   :  { %v334_v22 = vpop.permute.xlu2 %333 }
  0xe3   :  { %v227_v5 = vpop.permute.xlu1 %226 }
  0xe4   :  { %v242_v25 = vmul.f32 %v573_v12, %v227_v5  ;;  %v268_v12 = vpop.permute.xlu0 %267 }
  0xe6   :  { %v246_v7 = vadd.f32 %v242_v25, %v221_v6 }
  0xe8   :  { %v250_v8 = vmul.f32 0.01, %v246_v7 }
  0xea   :  { %v254_v9 = vmax.f32 %v246_v7, %v250_v8  ;;  %v359_v38 = vpop.permute.xlu2 %358 }
  0xec   :  { %306 = vmatpush.msra.mxu0 %v254_v9  ;;  %380 = vmatpush.msra.mxu1 %v254_v9  ;;  %v272_v10 = vpop.permute.xlu1 %271  ;;  %v338_v33 = vpop.permute.xlu0 %337 }
  0xed   :  { %381 = vmatpush.msra.mxu2 %v254_v9  ;;  %382 = vmatpush.msra.mxu3 %v254_v9 }
  0xee   :  { %367 = vmatmul.msk.f32.vlgmr.msra.gmra.mxu0 %vm278_vm0, %v258_v50  ;;  %368 = vmatmul.msk.f32.vlgmr.msra.gmra.mxu1 %vm278_vm0, %v259_v41 }
  0xef   :  { %369 = vmatmul.msk.f32.vlgmr.msra.gmra.mxu2 %vm278_vm0, %v260_v54  ;;  %370 = vmatmul.msk.f32.vlgmr.msra.gmra.mxu3 %vm278_vm0, %v261_v59 }
  0xf5   :  { %v330_v20 = vpop.permute.xlu1 %329 }
  0xfd   :  { %v342_v37 = vpop.permute.xlu1 %341 }
 0x16b   :  { %v308_v13 = vpop.f32.mrf.mxu0  ;;  %v311_v14 = vpop.f32.mrf.mxu1 }
 0x16c   :  { %v309_v15 = vadd.f32 %v308_v13, %v264_v0  ;;  %v312_v16 = vadd.f32 %v311_v14, %v268_v12 }
 0x16e   :  { %v320_v17 = vmul.f32 0.01, %v309_v15  ;;  %v321_v18 = vmul.f32 0.01, %v312_v16 }
 0x170   :  { %v324_v21 = vmax.f32 %v309_v15, %v320_v17  ;;  %v325_v23 = vmax.f32 %v312_v16, %v321_v18 }
 0x172   :  { %v314_v24 = vpop.f32.mrf.mxu2  ;;  %v317_v26 = vpop.f32.mrf.mxu3  ;;  %v344_v29 = vmul.f32 %v330_v20, %v324_v21  ;;  %v345_v31 = vmul.f32 %v334_v22, %v325_v23 }
 0x173   :  { %v315_v27 = vadd.f32 %v314_v24, %v272_v10  ;;  %v318_v28 = vadd.f32 %v317_v26, %v276_v11 }
 0x174   :  { %v348_v19 = vadd.f32 %v345_v31, %v344_v29 }
 0x175   :  { %v322_v30 = vmul.f32 0.01, %v315_v27  ;;  %v323_v32 = vmul.f32 0.01, %v318_v28 }
 0x177   :  { %v327_v34 = vmax.f32 %v318_v28, %v323_v32  ;;  %v326_v35 = vmax.f32 %v315_v27, %v322_v30 }
 0x179   :  { %v346_v36 = vmul.f32 %v338_v33, %v326_v35  ;;  %v347_v42 = vmul.f32 %v342_v37, %v327_v34 }
 0x17b   :  { %v349_v44 = vadd.f32 %v348_v19, %v346_v36 }
 0x17d   :  { %v350_v46 = vadd.f32 %v349_v44, %v347_v42 }
 0x17f   :  { %v351_v47 = vrot.slane %v350_v46, 4 }
 0x181   :  { %v352_v48 = vadd.f32 %v351_v47, %v350_v46 }
 0x183   :  { %v353_v49 = vrot.slane %v352_v48, 2 }
 0x185   :  { %v354_v51 = vadd.f32 %v353_v49, %v352_v48 }
 0x187   :  { %v355_v52 = vrot.slane %v354_v51, 1 }
 0x189   :  { %v356_v53 = vadd.f32 %v355_v52, %v354_v51 }
 0x18b   :  { %v361_v55 = vadd.f32 %v359_v38, %v356_v53 }
 0x18d   :  { %362 = vst [vmem:[%s614_s4] sm:$0x1] %v361_v55 }

</bundles_post_ra>
